<compile_context>
chip_gen: v6e
topology: v6e:2x2x1
jax: 0.10.0
libtpu: 0.0.40
codegen_flags: <defaults>
</compile_context>

<pallas_src>
import math

import jax
import jax.numpy as jnp
from jax.experimental import pallas as pl
from jax.experimental.pallas import tpu as pltpu


def _identity(t):
    return t


def _round_up(x, m):
    return -(-x // m) * m


# ---------------------------------------------------------------------------
# Path 1: identity activation (module default) -> collapsed polynomial,
#         lane-packed Horner evaluation on the VPU.
# ---------------------------------------------------------------------------

def _make_horner_kernel(n_terms):
    def kernel(x_ref, c_ref, o_ref):
        x = x_ref[...].astype(jnp.float32)            # (TB, 128) lane-dense
        c = c_ref[...].astype(jnp.float32)            # (n, 128) per-lane coeffs
        acc = jnp.broadcast_to(c[n_terms - 1], x.shape)
        for k in range(n_terms - 2, -1, -1):          # Horner: full-width FMAs
            acc = acc * x + c[k]
        o_ref[...] = acc.astype(o_ref.dtype)
    return kernel


def _collapse_to_coefficients(hidden_wts, hidden_bs, w_out, b_out, n_terms):
    """Fold the identity-activation Linear stack into per-variable polynomial
    coefficients c[v, k]; the total bias is absorbed into the x^0 coefficient.
    Tiny (V*n) one-time prep; reusable across calls."""
    f32 = jnp.float32
    w_out = w_out.astype(f32)
    if hidden_wts:
        W = hidden_wts[0].astype(f32)                 # (V, n, f1)
        b = hidden_bs[0].astype(f32)                  # (V, f1)
        for wt, bs in zip(hidden_wts[1:], hidden_bs[1:]):
            wt = wt.astype(f32)
            b = jnp.einsum('vb,vbc->vc', b, wt) + bs.astype(f32)
            W = jnp.einsum('vab,vbc->vac', W, wt)
        coef = jnp.einsum('vkf,vf->vk', W, w_out)     # (V, n)
        bias = jnp.einsum('vf,vf->v', b, w_out) + b_out.astype(f32)[0]
    else:
        coef = w_out                                  # (V, n)
        bias = b_out.astype(f32)[0]                   # (V,)
    coef = coef.at[:, 0].add(bias)                    # x^0 == 1 absorbs bias
    assert coef.shape[1] == n_terms, (coef.shape, n_terms)
    return coef


def _taylor_identity(x, coef, *, single_block_cap=1024, tile_rows=512):
    B, V = x.shape
    n_terms = coef.shape[1]
    N = B * V

    # Lane-pack the batch: flat index b*V+v -> (row, lane); since 128 % V == 0,
    # lane l always holds variable l % V.
    R0 = max(1, -(-N // 128))
    if R0 <= single_block_cap:
        block_rows, R = R0, R0            # single grid step; block == full array
    else:
        block_rows = tile_rows            # lane-dense tiles, "parallel" grid
        R = _round_up(R0, block_rows)

    x_flat = x.reshape(-1)
    pad = R * 128 - N
    if pad:
        x_flat = jnp.pad(x_flat, (0, pad))
    x_lanes = x_flat.reshape(R, 128)

    lane_v = jnp.arange(128) % V
    coef_lanes = jnp.transpose(coef[lane_v], (1, 0))  # (n, 128): coeff per lane

    out = pl.pallas_call(
        _make_horner_kernel(n_terms),
        out_shape=jax.ShapeDtypeStruct((R, 128), x.dtype),
        grid_spec=pltpu.PrefetchScalarGridSpec(
            num_scalar_prefetch=0,
            grid=(R // block_rows,),
            in_specs=[pl.BlockSpec((block_rows, 128), lambda i: (i, 0)),
                      pl.BlockSpec((n_terms, 128), lambda i: (0, 0))],
            out_specs=pl.BlockSpec((block_rows, 128), lambda i: (i, 0)),
        ),
        compiler_params=pltpu.CompilerParams(
            dimension_semantics=("parallel",)),
    )(x_lanes, coef_lanes)

    return out.reshape(-1)[:N].reshape(B, V)


# ---------------------------------------------------------------------------
# Path 2: arbitrary activation -> block-diagonal matmul kernel (fallback).
# ---------------------------------------------------------------------------

def _make_blockdiag_kernel(n_terms, num_layers, activation, precision):
    def kernel(x_ref, *refs):
        o_ref = refs[-1]
        w_refs = refs[:-1]
        x = x_ref[...]                                # (TB, V)

        # Powers of the whole tile; power-major column layout k*V + v.
        p = jnp.ones_like(x)                          # x^0 == 1 (torch.pow(x,0))
        powers = [p]
        for _ in range(n_terms - 1):
            p = p * x
            powers.append(p)
        h = jnp.concatenate(powers, axis=1)           # (TB, n*V)

        for l in range(num_layers - 1):
            w = w_refs[2 * l][...]
            b = w_refs[2 * l + 1][...]
            h = jnp.dot(h, w, preferred_element_type=jnp.float32,
                        precision=precision) + b
            h = activation(h)
            # TODO(synk): dropout > 0 not implemented (default dropout=0 is a no-op)

        w = w_refs[2 * (num_layers - 1)][...]
        b = w_refs[2 * (num_layers - 1) + 1][...]
        out = jnp.dot(h, w, preferred_element_type=jnp.float32,
                      precision=precision) + b        # (TB, V) folded reduction
        o_ref[...] = out.astype(o_ref.dtype)
    return kernel


def _pick_block_b(B, min_sub, cap=2048):
    # Single largest sublane-aligned divisor of B: v5e/v6e have 1 TC per chip,
    # so extra grid steps are pure ~0.35us/step overhead for this small kernel.
    cap = min(B, cap)
    for c in range(cap - cap % min_sub, min_sub - 1, -min_sub):
        if B % c == 0:
            return c
    return B


def _taylor_general(x, hidden_wts, hidden_bs, w_out, b_out, *,
                    n_terms, activation, precision, block_b=None):
    B, V = x.shape
    itemsize = jnp.dtype(x.dtype).itemsize
    min_sub = max(8, 32 // itemsize)
    if block_b is None:
        block_b = _pick_block_b(B, min_sub)
    assert B % block_b == 0, (B, block_b)

    num_layers = len(hidden_wts) + 1

    # Block-diagonal weights (XLA prep, non-default path only).
    # TODO(synk): for repeated calls / large n_var, precompute these V^2-sized
    # constants once and keep them single-buffered to respect v7x's 64 MiB VMEM.
    eye = jnp.eye(V, dtype=x.dtype)
    layer_wts = [w.astype(x.dtype) for w in hidden_wts] \
        + [w_out.astype(x.dtype)[:, :, None]]         # each (V, f_in, f_out)
    big_ws = []
    for li, wt in enumerate(layer_wts):
        f_in, f_out = wt.shape[1], wt.shape[2]
        w4 = jnp.einsum('vij,vu->viuj', wt, eye)      # (V, f_in, V, f_out)
        if li == 0:
            w4 = jnp.transpose(w4, (1, 0, 2, 3))      # power-major rows (k, v)
        big_ws.append(w4.reshape(V * f_in, V * f_out))
    big_bs = [b.astype(x.dtype).reshape(1, -1) for b in hidden_bs] \
        + [b_out.astype(x.dtype).reshape(1, -1)]

    weight_args = []
    for w, b in zip(big_ws, big_bs):
        weight_args += [w, b]

    kernel = _make_blockdiag_kernel(n_terms, num_layers, activation, precision)
    # Constant index_map -> weights are not re-fetched between grid steps;
    # blocks equal the full arrays, so no (8,128) constraint applies.
    weight_specs = [pl.BlockSpec(a.shape, lambda i: (0, 0)) for a in weight_args]

    return pl.pallas_call(
        kernel,
        out_shape=jax.ShapeDtypeStruct((B, V), x.dtype),
        grid_spec=pltpu.PrefetchScalarGridSpec(
            num_scalar_prefetch=0,
            grid=(B // block_b,),
            in_specs=[pl.BlockSpec((block_b, V), lambda i: (i, 0))] + weight_specs,
            out_specs=pl.BlockSpec((block_b, V), lambda i: (i, 0)),
        ),
        compiler_params=pltpu.CompilerParams(
            dimension_semantics=("parallel",)),
    )(x, *weight_args)


# ---------------------------------------------------------------------------
# Public entry point
# ---------------------------------------------------------------------------

def separated_taylor_series(x, hidden_wts, hidden_bs, w_out, b_out, *,
                            n_terms, activation=_identity, force_general=False,
                            precision=jax.lax.Precision.HIGHEST):
    B, V = x.shape
    identity_act = (activation is None) or (activation is _identity)
    if identity_act and (128 % V == 0) and not force_general:
        coef = _collapse_to_coefficients(hidden_wts, hidden_bs, w_out, b_out,
                                         n_terms)
        return _taylor_identity(x, coef)
    return _taylor_general(x, hidden_wts, hidden_bs, w_out, b_out,
                           n_terms=n_terms,
                           activation=(activation or _identity),
                           precision=precision)


# ---------------------------------------------------------------------------
# Params + plain-JAX reference (mirrors the PyTorch forward)
# ---------------------------------------------------------------------------

def init_params(key, n_terms, features, n_var, dtype=jnp.float32):
    """Deterministic nn.Linear-style init, stacked across the n_var sub-modules."""
    dims = [n_terms] + list(features) + [1]
    hidden_wts, hidden_bs = [], []
    w_out = b_out = None
    for i in range(len(dims) - 1):
        f_in, f_out = dims[i], dims[i + 1]
        key, kw, kb = jax.random.split(key, 3)
        bound = 1.0 / math.sqrt(f_in)
        w = jax.random.uniform(kw, (n_var, f_out, f_in), dtype, -bound, bound)
        b = jax.random.uniform(kb, (n_var, f_out), dtype, -bound, bound)
        if i < len(dims) - 2:
            hidden_wts.append(jnp.transpose(w, (0, 2, 1)))   # (V, f_in, f_out)
            hidden_bs.append(b)                              # (V, f_out)
        else:
            w_out = w[:, 0, :]                               # (V, f_last)
            b_out = b.T                                      # (1, V)
    return hidden_wts, hidden_bs, w_out, b_out


def reference(x, hidden_wts, hidden_bs, w_out, b_out, n_terms,
              activation=_identity):
    exps = jnp.arange(n_terms, dtype=x.dtype)
    h = x[..., None] ** exps                                 # (B, V, n)
    for wt, b in zip(hidden_wts, hidden_bs):
        h = jnp.einsum('bvk,vkf->bvf', h, wt,
                       precision=jax.lax.Precision.HIGHEST) + b[None]
        h = activation(h)
    return jnp.sum(h * w_out[None], axis=-1) + b_out         # (B, V)


if __name__ == "__main__":
    key = jax.random.PRNGKey(0)
    B, n_var, n_terms, hidden = 256, 4, 8, 32

    kx, kp = jax.random.split(key)
    # Inputs near the expansion point, as is typical for a Taylor model.
    x = 0.5 * jax.random.normal(kx, (B, n_var), jnp.float32)
    hidden_wts, hidden_bs, w_out, b_out = init_params(kp, n_terms, (hidden,), n_var)

    # Path 1: identity activation (module default) -> lane-packed Horner kernel.
    y = separated_taylor_series(x, hidden_wts, hidden_bs, w_out, b_out,
                                n_terms=n_terms)
    y = jax.block_until_ready(y)
    y_ref = reference(x, hidden_wts, hidden_bs, w_out, b_out, n_terms)
    assert y.shape == (B, n_var), y.shape
    err = float(jnp.max(jnp.abs(y - y_ref)))
    assert jnp.allclose(y, y_ref, rtol=1e-3, atol=1e-3), err

    # Path 2: arbitrary activation -> block-diagonal matmul kernel.
    y2 = separated_taylor_series(x, hidden_wts, hidden_bs, w_out, b_out,
                                 n_terms=n_terms, activation=jnp.tanh)
    y2 = jax.block_until_ready(y2)
    y2_ref = reference(x, hidden_wts, hidden_bs, w_out, b_out, n_terms,
                       activation=jnp.tanh)
    err2 = float(jnp.max(jnp.abs(y2 - y2_ref)))
    assert jnp.allclose(y2, y2_ref, rtol=1e-3, atol=1e-3), err2

    print("KERNEL_OK")
</pallas_src>

<mosaic_0001>
module attributes {stable_mosaic.version = 11 : i64} {
  func.func @kernel(%arg0: i32, %arg1: memref<8x128xf32, #tpu.memory_space<vmem>>, %arg2: memref<8x128xf32, #tpu.memory_space<vmem>>, %arg3: memref<8x128xf32, #tpu.memory_space<vmem>>) attributes {dimension_semantics = [#tpu.dimension_semantics<parallel>], iteration_bounds = array<i64: 1>, scalar_prefetch = 0 : i64, scratch_operands = 0 : i64, tpu.core_type = #tpu.core_type<tc>, window_params = [{transform_indices = @transform_0, window_bounds = array<i64: 8, 128>}, {pipeline_mode = #tpu.pipeline_mode<synchronous>, transform_indices = @transform_1, window_bounds = array<i64: 8, 128>}, {transform_indices = @transform_2, window_bounds = array<i64: 8, 128>}]} {
    %c0 = arith.constant 0 : index
    %c0_0 = arith.constant 0 : index
    %0 = vector.load %arg1[%c0, %c0_0] : memref<8x128xf32, #tpu.memory_space<vmem>>, vector<8x128xf32>
    %c0_1 = arith.constant 0 : index
    %c0_2 = arith.constant 0 : index
    %1 = vector.load %arg2[%c0_1, %c0_2] : memref<8x128xf32, #tpu.memory_space<vmem>>, vector<8x128xf32>
    %2 = vector.extract_strided_slice %1 {offsets = [7, 0], sizes = [1, 128], strides = [1, 1]} : vector<8x128xf32> to vector<1x128xf32>
    %3 = vector.shape_cast %2 : vector<1x128xf32> to vector<128xf32>
    %4 = vector.shape_cast %3 : vector<128xf32> to vector<1x128xf32>
    %5 = vector.broadcast %4 : vector<1x128xf32> to vector<8x128xf32>
    %6 = arith.mulf %5, %0 : vector<8x128xf32>
    %7 = vector.extract_strided_slice %1 {offsets = [6, 0], sizes = [1, 128], strides = [1, 1]} : vector<8x128xf32> to vector<1x128xf32>
    %8 = vector.shape_cast %7 : vector<1x128xf32> to vector<128xf32>
    %9 = vector.shape_cast %8 : vector<128xf32> to vector<1x128xf32>
    %10 = vector.broadcast %9 : vector<1x128xf32> to vector<8x128xf32>
    %11 = arith.addf %6, %10 : vector<8x128xf32>
    %12 = arith.mulf %11, %0 : vector<8x128xf32>
    %13 = vector.extract_strided_slice %1 {offsets = [5, 0], sizes = [1, 128], strides = [1, 1]} : vector<8x128xf32> to vector<1x128xf32>
    %14 = vector.shape_cast %13 : vector<1x128xf32> to vector<128xf32>
    %15 = vector.shape_cast %14 : vector<128xf32> to vector<1x128xf32>
    %16 = vector.broadcast %15 : vector<1x128xf32> to vector<8x128xf32>
    %17 = arith.addf %12, %16 : vector<8x128xf32>
    %18 = arith.mulf %17, %0 : vector<8x128xf32>
    %19 = vector.extract_strided_slice %1 {offsets = [4, 0], sizes = [1, 128], strides = [1, 1]} : vector<8x128xf32> to vector<1x128xf32>
    %20 = vector.shape_cast %19 : vector<1x128xf32> to vector<128xf32>
    %21 = vector.shape_cast %20 : vector<128xf32> to vector<1x128xf32>
    %22 = vector.broadcast %21 : vector<1x128xf32> to vector<8x128xf32>
    %23 = arith.addf %18, %22 : vector<8x128xf32>
    %24 = arith.mulf %23, %0 : vector<8x128xf32>
    %25 = vector.extract_strided_slice %1 {offsets = [3, 0], sizes = [1, 128], strides = [1, 1]} : vector<8x128xf32> to vector<1x128xf32>
    %26 = vector.shape_cast %25 : vector<1x128xf32> to vector<128xf32>
    %27 = vector.shape_cast %26 : vector<128xf32> to vector<1x128xf32>
    %28 = vector.broadcast %27 : vector<1x128xf32> to vector<8x128xf32>
    %29 = arith.addf %24, %28 : vector<8x128xf32>
    %30 = arith.mulf %29, %0 : vector<8x128xf32>
    %31 = vector.extract_strided_slice %1 {offsets = [2, 0], sizes = [1, 128], strides = [1, 1]} : vector<8x128xf32> to vector<1x128xf32>
    %32 = vector.shape_cast %31 : vector<1x128xf32> to vector<128xf32>
    %33 = vector.shape_cast %32 : vector<128xf32> to vector<1x128xf32>
    %34 = vector.broadcast %33 : vector<1x128xf32> to vector<8x128xf32>
    %35 = arith.addf %30, %34 : vector<8x128xf32>
    %36 = arith.mulf %35, %0 : vector<8x128xf32>
    %37 = vector.extract_strided_slice %1 {offsets = [1, 0], sizes = [1, 128], strides = [1, 1]} : vector<8x128xf32> to vector<1x128xf32>
    %38 = vector.shape_cast %37 : vector<1x128xf32> to vector<128xf32>
    %39 = vector.shape_cast %38 : vector<128xf32> to vector<1x128xf32>
    %40 = vector.broadcast %39 : vector<1x128xf32> to vector<8x128xf32>
    %41 = arith.addf %36, %40 : vector<8x128xf32>
    %42 = arith.mulf %41, %0 : vector<8x128xf32>
    %43 = vector.extract_strided_slice %1 {offsets = [0, 0], sizes = [1, 128], strides = [1, 1]} : vector<8x128xf32> to vector<1x128xf32>
    %44 = vector.shape_cast %43 : vector<1x128xf32> to vector<128xf32>
    %45 = vector.shape_cast %44 : vector<128xf32> to vector<1x128xf32>
    %46 = vector.broadcast %45 : vector<1x128xf32> to vector<8x128xf32>
    %47 = arith.addf %42, %46 : vector<8x128xf32>
    %c0_3 = arith.constant 0 : index
    %c0_4 = arith.constant 0 : index
    %48 = vector.load %arg3[%c0_3, %c0_4] : memref<8x128xf32, #tpu.memory_space<vmem>>, vector<8x128xf32>
    tpu.vector_store %arg3[%c0_3, %c0_4], %47 {strides = array<i32>} : memref<8x128xf32, #tpu.memory_space<vmem>>, vector<8x128xf32>,
    return
  }
  func.func @transform_0(%arg0: i32) -> (i32, i32) {
    %c0_i32 = arith.constant 0 : i32
    %c0_i32_0 = arith.constant 0 : i32
    return %arg0, %c0_i32 : i32, i32
  }
  func.func @transform_1(%arg0: i32) -> (i32, i32) {
    %c0_i32 = arith.constant 0 : i32
    %c0_i32_0 = arith.constant 0 : i32
    %c0_i32_1 = arith.constant 0 : i32
    return %c0_i32, %c0_i32_0 : i32, i32
  }
  func.func @transform_2(%arg0: i32) -> (i32, i32) {
    %c0_i32 = arith.constant 0 : i32
    %c0_i32_0 = arith.constant 0 : i32
    return %arg0, %c0_i32 : i32, i32
  }
}

</mosaic_0001>

<bundles_post_ra>
// kernel: tpu_custom_call.1
= control target key start
LH: loop header
LB: loop body
LE: loop exit
PB: predicated region body
PF: predicated region fallthrough
CT: control target
= control target key end

     0   :  { %7 = vsyncpa [#allocation3], 0  ;;  %s197_s0 = inlined_call_operand.hbm [shape: f32[8,128], index: 0, kind: input, shape index: {}]   ;;  %s198_s1 = inlined_call_operand.hbm [shape: f32[8,128], index: 1, kind: input, shape index: {}]   ;;  %s199_s2 = inlined_call_operand.hbm [shape: f32[8,128], index: 2, kind: output, shape index: {}]  }
   0x1   :  { %8 = vsyncpa [#allocation6], 0 }
   0x2   :  { %9 = vsyncpa [#allocation4], 0  ;;  %s170_s9 = smov [#allocation2]   ;;  %s171_s11 = smov [#allocation5]  }
   0x3   :  { %s16_s10 = sshll.u32 %s170_s9, 4  ;;  %s26_s12 = sshll.u32 %s171_s11, 4  ;;  %s17_s10 = int_to_ptr.vmem [resolvable:$true] %s16_s10  ;;  %s27_s12 = int_to_ptr.vmem [resolvable:$true] %s26_s12 }
   0x4   :  { %s112_s13 = scalar_lea.vmem %s17_s10, 128  ;;  %p117_p1 = scmp.lt.s32.totalorder %s17_s10, %s17_s10 }
   0x5   :  { %p113_p0 = scmp.ne.s32.totalorder %s17_s10, %s112_s13  ;;  %p118_p2 = scmp.lt.s32.totalorder %s112_s13, %s112_s13 }
   0x7   :  { %p119_p3 = por %p118_p2, %p117_p1 }
   0x9   :  { %p120_p4 = pnand %p119_p3, %p113_p0 }
   0xb   :  { %123 = shalt.err (!%p120_p4)
}
   0xc   :  { %19 = dma.hbm_to_vmem [thread:$0]  %s197_s0, 128, %s17_s10, [#allocation3]  }
   0xd   :  { %s132_s16 = scalar_lea.vmem %s27_s12, 128  ;;  %p137_p6 = scmp.lt.s32.totalorder %s27_s12, %s27_s12 }
   0xe   :  { %p133_p5 = scmp.ne.s32.totalorder %s27_s12, %s132_s16  ;;  %p138_p7 = scmp.lt.s32.totalorder %s132_s16, %s132_s16 }
  0x10   :  { %p139_p8 = por %p138_p7, %p137_p6 }
  0x12   :  { %p140_p9 = pnand %p139_p8, %p133_p5 }
  0x14   :  { %143 = shalt.err (!%p140_p9)
}
  0x15   :  { %29 = dma.hbm_to_vmem [thread:$0]  %s198_s1, 128, %s27_s12, [#allocation6]  }
  0x16   :  { %164 = dma.done.wait [#allocation3], 128  }
  0x17   :  { %165 = vsyncadd [#allocation3], 4294967168 }
  0x18   :  { %166 = dma.done.wait [#allocation6], 128  }
  0x19   :  { %167 = vsyncadd [#allocation6], 4294967168  ;;  %v38_v0 = vlaneseq  ;;  %v36_v4 = vld [vmem:[#allocation2] sm:$0xff]  ;;  %v37_v5 = vld [vmem:[#allocation5] sm:$0xff]  ;;  %s172_s0 = smov [#allocation7]  }
  0x1a   :  { %s91_s1 = sshll.u32 %s172_s0, 4  ;;  %s92_s1 = int_to_ptr.vmem [resolvable:$true] %s91_s1 }
  0x1b   :  { %v39_v1 = vshrl.u32 %v38_v0, 7  ;;  %s144_s19 = scalar_lea.vmem %s92_s1, 128  ;;  %p149_p11 = scmp.lt.s32.totalorder %s92_s1, %s92_s1 }
  0x1c   :  { %p145_p10 = scmp.ne.s32.totalorder %s92_s1, %s144_s19  ;;  %p150_p12 = scmp.lt.s32.totalorder %s144_s19, %s144_s19 }
  0x1d   :  { %v40_v2 = vsub.s32 7, %v39_v1  ;;  %v45_v3 = vsub.s32 6, %v39_v1  ;;  %v51_v8 = vsub.s32 5, %v39_v1  ;;  %v57_v12 = vsub.s32 4, %v39_v1 }
  0x1e   :  { %v63_v16 = vsub.s32 3, %v39_v1  ;;  %v69_v20 = vsub.s32 2, %v39_v1  ;;  %v75_v24 = vsub.s32 1, %v39_v1  ;;  %v81_v28 = vsub.s32 0, %v39_v1  ;;  %p151_p13 = por %p150_p12, %p149_p11 }
  0x1f   :  { %v41_v6 = vrot.slane %v37_v5, %v40_v2  ;;  %v46_v7 = vrot.slane %v37_v5, %v45_v3  ;;  %v52_v11 = vrot.slane %v37_v5, %v51_v8  ;;  %v58_v15 = vrot.slane %v37_v5, %v57_v12 }
  0x20   :  { %v64_v19 = vrot.slane %v37_v5, %v63_v16  ;;  %v70_v23 = vrot.slane %v37_v5, %v69_v20  ;;  %v76_v27 = vrot.slane %v37_v5, %v75_v24  ;;  %v82_v31 = vrot.slane %v37_v5, %v81_v28  ;;  %p152_p0 = pnand %p151_p13, %p145_p10 }
  0x21   :  { %v42_v9 = vmul.f32 %v41_v6, %v36_v4 }
  0x23   :  { %v47_v10 = vadd.f32 %v46_v7, %v42_v9 }
  0x25   :  { %v48_v13 = vmul.f32 %v47_v10, %v36_v4 }
  0x27   :  { %v53_v14 = vadd.f32 %v52_v11, %v48_v13 }
  0x29   :  { %v54_v17 = vmul.f32 %v53_v14, %v36_v4 }
  0x2b   :  { %v59_v18 = vadd.f32 %v58_v15, %v54_v17 }
  0x2d   :  { %v60_v21 = vmul.f32 %v59_v18, %v36_v4 }
  0x2f   :  { %v65_v22 = vadd.f32 %v64_v19, %v60_v21 }
  0x31   :  { %v66_v25 = vmul.f32 %v65_v22, %v36_v4 }
  0x33   :  { %v71_v26 = vadd.f32 %v70_v23, %v66_v25 }
  0x35   :  { %v72_v29 = vmul.f32 %v71_v26, %v36_v4 }
  0x37   :  { %v77_v30 = vadd.f32 %v76_v27, %v72_v29 }
  0x39   :  { %v78_v32 = vmul.f32 %v77_v30, %v36_v4 }
  0x3b   :  { %v83_v33 = vadd.f32 %v82_v31, %v78_v32 }
  0x3d   :  { %84 = vst [vmem:[#allocation7] sm:$0xff] %v83_v33 }
  0x3e   :  { %155 = shalt.err (!%p152_p0)
}
  0x3f   :  { %94 = dma.vmem_to_hbm [thread:$0]  %s92_s1, 128, %s199_s2, [#allocation4]  }
  0x40   :  { %168 = dma.done.wait [#allocation4], 128  }
  0x41   :  { %169 = vsyncadd [#allocation4], 4294967168 }
  0x42   :  { %98 = vsyncpa [#allocation3], 1 }
  0x43   :  { %99 = vsyncpa [#allocation6], 1 }
  0x44   :  { %100 = vsyncpa [#allocation4], 1 }

</bundles_post_ra>
